<compile_context>
chip_gen: v6e
topology: v6e:2x2x1
jax: 0.10.0
libtpu: 0.0.40
codegen_flags: <defaults>
</compile_context>

<pallas_src>
import jax
import jax.numpy as jnp
from jax.experimental import pallas as pl
from jax.experimental.pallas import tpu as pltpu


def _round_up(x: int, m: int) -> int:
    return ((x + m - 1) // m) * m


def _pick_tile(padded: int, cap: int, unit: int = 128) -> int:
    """Largest multiple of `unit` that divides `padded` and is <= cap.

    `padded` is assumed to already be a multiple of `unit`.  Returns the full
    extent when it fits under the cap (contiguous, descriptor-light DMAs).
    """
    if padded <= cap:
        return padded
    best = unit
    t = unit
    while t <= cap:
        if padded % t == 0:
            best = t
        t += unit
    return best


def _pick_batch_tile(b_pad: int, cap: int = 128, unit: int = 16) -> int:
    """Largest multiple of `unit` <= cap that divides b_pad."""
    best = unit
    t = unit
    while t <= min(cap, b_pad):
        if b_pad % t == 0:
            best = t
        t += unit
    return best


# --------------------------------------------------------------------------
# Kernels
# --------------------------------------------------------------------------
def _matmul_bias_kernel(x_ref, w_ref, b_ref, o_ref):
    """Single-K-step  feature = x @ W + b.  No accumulator, no phase gating."""
    o_ref[...] = (
        jnp.dot(x_ref[...], w_ref[...], preferred_element_type=jnp.float32)
        + b_ref[...]
    ).astype(o_ref.dtype)


def _matmul_bias_acc_kernel(x_ref, w_ref, b_ref, o_ref, acc_ref):
    """Tiled  feature = x @ W + b  with K-axis accumulation in f32 VMEM."""
    k = pl.program_id(2)

    @pl.when(k == 0)
    def _():
        acc_ref[...] = jnp.zeros_like(acc_ref)

    acc_ref[...] += jnp.dot(
        x_ref[...], w_ref[...], preferred_element_type=jnp.float32
    )

    @pl.when(k == pl.num_programs(2) - 1)
    def _():
        o_ref[...] = (acc_ref[...] + b_ref[...]).astype(o_ref.dtype)


# --------------------------------------------------------------------------
# Module
# --------------------------------------------------------------------------
class CLBackbone:
    """JAX/Pallas counterpart of the PyTorch CLBackbone base class."""

    # Tile caps (VMEM-budgeted so the double-buffered working set stays well
    # under v7x's scoped VMEM even at tm=128).
    _TN_CAP = 1024                       # W tile width (lanes)
    _TK_CAP = 4096                       # W tile depth
    _W_TILE_BYTES_CAP = 8 * 1024 * 1024  # per-buffer W tile budget

    def __init__(self, output_dim: int, input_dim: int) -> None:
        self.output_dim = output_dim
        self.input_dim = input_dim
        self.task_id = None
        self.sanity_check_CLBackbone()

        # ---- deterministic synthetic parameters (no checkpoint load) ------
        kw, kb = jax.random.split(jax.random.PRNGKey(0))
        scale = 1.0 / jnp.sqrt(jnp.float32(input_dim))
        w_f32 = jax.random.normal(kw, (input_dim, output_dim), jnp.float32) * scale
        b_f32 = jax.random.normal(kb, (1, output_dim), jnp.float32) * 0.01

        # bf16 weights -> halve the dominant HBM stream, native MXU dtype on
        # all generations.  Bias kept in f32 (epilogue add only).
        self.weight = w_f32.astype(jnp.bfloat16)   # (K, N) bf16
        self.bias = b_f32                           # (1, N) f32

        # ---- 128-granular padding + divisor-aware tile selection ----------
        self._n_pad = _round_up(output_dim, 128)
        self._k_pad = _round_up(input_dim, 128)

        # Full-N tile when it fits (contiguous W rows, bias fully resident).
        self._tn = _pick_tile(self._n_pad, self._TN_CAP)
        tk_cap = min(
            self._TK_CAP,
            max(128, (self._W_TILE_BYTES_CAP // (self._tn * 2)) // 128 * 128),
        )
        self._tk = _pick_tile(self._k_pad, tk_cap)
        self._grid_n = self._n_pad // self._tn
        self._grid_k = self._k_pad // self._tk

        # Pre-padded parameters (zero K-padding contributes 0 to the dot;
        # padded N columns are sliced off in the wrapper).
        self._w_padded = jnp.pad(
            self.weight,
            ((0, self._k_pad - input_dim), (0, self._n_pad - output_dim)),
        )
        self._b_padded = jnp.pad(self.bias, ((0, 0), (0, self._n_pad - output_dim)))

        # Fuse reshape / pad / cast / slice with the pallas_call under one jit.
        self._jit_forward = jax.jit(self._forward_impl)

    # ------------------------------------------------------------------ API
    def sanity_check_CLBackbone(self) -> None:
        pass

    def setup_task_id(self, task_id: int) -> None:
        self.task_id = task_id

    # ------------------------------------------------------------- forward
    def _forward_impl(self, x, w_padded, b_padded):
        B = x.shape[0]
        x2d = x.reshape(B, -1)  # same as torch .flatten(1)
        assert x2d.shape[1] == self.input_dim

        # Batch: pad to the bf16 sublane pair (16); tm = largest multiple of
        # 16 (<=128) dividing the padded batch -> no >2x batch blowup.
        b_pad = _round_up(max(B, 16), 16)
        tm = _pick_batch_tile(b_pad)
        grid_m = b_pad // tm

        x_p = jnp.pad(
            x2d.astype(jnp.bfloat16),
            ((0, b_pad - B), (0, self._k_pad - self.input_dim)),
        )

        tn, tk = self._tn, self._tk
        grid_n, grid_k = self._grid_n, self._grid_k

        # VMEM budget: double-buffered x / W / out, accumulator, bias.
        vmem_needed = (
            2 * tm * tk * 2            # x   (bf16, 2 buffers)
            + 2 * tk * tn * 2          # W   (bf16, 2 buffers)
            + 2 * tm * tn * 4          # out (f32,  2 buffers)
            + tm * tn * 4              # acc scratch
            + 2 * tn * 4               # bias
        )
        vmem_limit = min(vmem_needed + (8 << 20), 32 << 20)

        # Cost estimate including re-fetch multiplicity.
        cost = pl.CostEstimate(
            flops=2 * b_pad * self._k_pad * self._n_pad,
            transcendentals=0,
            bytes_accessed=(
                grid_n * b_pad * self._k_pad * 2          # x (re-read per N tile)
                + grid_m * self._k_pad * self._n_pad * 2  # W (re-read per M tile)
                + grid_m * grid_n * tn * 4                # bias (K-resident)
                + b_pad * self._n_pad * 4                 # out writeback
            ),
        )

        out_shape = jax.ShapeDtypeStruct((b_pad, self._n_pad), jnp.float32)

        if grid_k == 1:
            # Single K step: whole (padded) K fits one tile -> no scratch
            # accumulator, no pl.when phases, 2-D grid.
            out_padded = pl.pallas_call(
                _matmul_bias_kernel,
                out_shape=out_shape,
                grid_spec=pltpu.PrefetchScalarGridSpec(
                    num_scalar_prefetch=0,
                    grid=(grid_m, grid_n),
                    in_specs=[
                        pl.BlockSpec((tm, tk), lambda i, j: (i, 0)),   # x
                        pl.BlockSpec((tk, tn), lambda i, j: (0, j)),   # W
                        pl.BlockSpec((1, tn), lambda i, j: (0, j)),    # b
                    ],
                    out_specs=pl.BlockSpec((tm, tn), lambda i, j: (i, j)),
                ),
                compiler_params=pltpu.CompilerParams(
                    dimension_semantics=("parallel", "parallel"),
                    vmem_limit_bytes=vmem_limit,
                ),
                cost_estimate=cost,
            )(x_p, w_padded, b_padded)
        else:
            out_padded = pl.pallas_call(
                _matmul_bias_acc_kernel,
                out_shape=out_shape,
                grid_spec=pltpu.PrefetchScalarGridSpec(
                    num_scalar_prefetch=0,
                    grid=(grid_m, grid_n, grid_k),
                    in_specs=[
                        pl.BlockSpec((tm, tk), lambda i, j, k: (i, k)),   # x
                        pl.BlockSpec((tk, tn), lambda i, j, k: (k, j)),   # W
                        pl.BlockSpec((1, tn), lambda i, j, k: (0, j)),    # b (K-resident)
                    ],
                    out_specs=pl.BlockSpec((tm, tn), lambda i, j, k: (i, j)),
                    scratch_shapes=[pltpu.VMEM((tm, tn), jnp.float32)],
                ),
                compiler_params=pltpu.CompilerParams(
                    dimension_semantics=("parallel", "parallel", "arbitrary"),
                    vmem_limit_bytes=vmem_limit,
                ),
                cost_estimate=cost,
            )(x_p, w_padded, b_padded)

        return out_padded[:B, : self.output_dim]

    def forward(self, x, stage: str, task_id: int | None = None):
        """x: (B, C, H, W) NCHW float tensor -> feature (B, output_dim) f32."""
        del stage, task_id  # API parity with the abstract base class only.
        return self._jit_forward(x, self._w_padded, self._b_padded)

    __call__ = forward


if __name__ == "__main__":
    # Small shapes consistent with the module's contract.
    B, C, H, W = 2, 4, 16, 16
    output_dim = 32
    input_dim = C * H * W

    backbone = CLBackbone(output_dim=output_dim, input_dim=input_dim)
    backbone.setup_task_id(1)

    x = jax.random.normal(jax.random.PRNGKey(0), (B, C, H, W), jnp.float32)

    feature = backbone(x, stage="train", task_id=backbone.task_id)
    feature = jax.block_until_ready(feature)

    # Reference check in plain JAX (same bf16 inputs, f32 accumulation).
    x_bf16 = x.reshape(B, -1).astype(jnp.bfloat16)
    ref = (
        x_bf16.astype(jnp.float32) @ backbone.weight.astype(jnp.float32)
        + backbone.bias
    )
    assert feature.shape == (B, output_dim)
    assert feature.dtype == jnp.float32
    assert jnp.allclose(feature, ref, atol=1e-3, rtol=1e-3)

    print("KERNEL_OK")
</pallas_src>

<mosaic_0001>
module attributes {stable_mosaic.version = 11 : i64} {
  func.func @_matmul_bias_kernel(%arg0: i32, %arg1: i32, %arg2: memref<16x1024xbf16, #tpu.memory_space<vmem>>, %arg3: memref<1024x128xbf16, #tpu.memory_space<vmem>>, %arg4: memref<1x128xf32, #tpu.memory_space<vmem>>, %arg5: memref<16x128xf32, #tpu.memory_space<vmem>>) attributes {dimension_semantics = [#tpu.dimension_semantics<parallel>, #tpu.dimension_semantics<parallel>], iteration_bounds = array<i64: 1, 1>, scalar_prefetch = 0 : i64, scratch_operands = 0 : i64, tpu.core_type = #tpu.core_type<tc>, window_params = [{transform_indices = @transform_0, window_bounds = array<i64: 16, 1024>}, {transform_indices = @transform_1, window_bounds = array<i64: 1024, 128>}, {transform_indices = @transform_2, window_bounds = array<i64: 1, 128>}, {transform_indices = @transform_3, window_bounds = array<i64: 16, 128>}]} {
    %c0 = arith.constant 0 : index
    %c0_0 = arith.constant 0 : index
    %0 = vector.load %arg2[%c0, %c0_0] : memref<16x1024xbf16, #tpu.memory_space<vmem>>, vector<16x1024xbf16>
    %c0_1 = arith.constant 0 : index
    %c0_2 = arith.constant 0 : index
    %1 = vector.load %arg3[%c0_1, %c0_2] : memref<1024x128xbf16, #tpu.memory_space<vmem>>, vector<1024x128xbf16>
    %cst = arith.constant dense<0.000000e+00> : vector<16x128xf32>
    %2 = tpu.matmul %0, %1, %cst {dimension_numbers = #tpu.dot_dimension_numbers<[1], [0], [0], [1], [0, 0, 1, 1], [], []>} : vector<16x1024xbf16>, vector<1024x128xbf16>, vector<16x128xf32> -> vector<16x128xf32>
    %c0_3 = arith.constant 0 : index
    %c0_4 = arith.constant 0 : index
    %3 = vector.load %arg4[%c0_3, %c0_4] : memref<1x128xf32, #tpu.memory_space<vmem>>, vector<1x128xf32>
    %4 = vector.broadcast %3 : vector<1x128xf32> to vector<16x128xf32>
    %5 = arith.addf %2, %4 : vector<16x128xf32>
    %c0_5 = arith.constant 0 : index
    %c0_6 = arith.constant 0 : index
    %6 = vector.load %arg5[%c0_5, %c0_6] : memref<16x128xf32, #tpu.memory_space<vmem>>, vector<16x128xf32>
    tpu.vector_store %arg5[%c0_5, %c0_6], %5 {strides = array<i32>} : memref<16x128xf32, #tpu.memory_space<vmem>>, vector<16x128xf32>,
    return
  }
  func.func @transform_0(%arg0: i32, %arg1: i32) -> (i32, i32) {
    %c0_i32 = arith.constant 0 : i32
    %c0_i32_0 = arith.constant 0 : i32
    return %arg0, %c0_i32 : i32, i32
  }
  func.func @transform_1(%arg0: i32, %arg1: i32) -> (i32, i32) {
    %c0_i32 = arith.constant 0 : i32
    %c0_i32_0 = arith.constant 0 : i32
    return %c0_i32, %arg1 : i32, i32
  }
  func.func @transform_2(%arg0: i32, %arg1: i32) -> (i32, i32) {
    %c0_i32 = arith.constant 0 : i32
    %c0_i32_0 = arith.constant 0 : i32
    return %c0_i32, %arg1 : i32, i32
  }
  func.func @transform_3(%arg0: i32, %arg1: i32) -> (i32, i32) {
    %c0_i32 = arith.constant 0 : i32
    return %arg0, %arg1 : i32, i32
  }
}

</mosaic_0001>

<bundles_post_ra>
// kernel: _forward_impl.1
= control target key start
LH: loop header
LB: loop body
LE: loop exit
PB: predicated region body
PF: predicated region fallthrough
CT: control target
= control target key end

     0   :  { %8 = vsyncpa [#allocation3], 0  ;;  %s1017_s12 = smov [#allocation2]   ;;  %s1076_s0 = inlined_call_operand.vmem [shape: bf16[16,1024], index: 0, kind: input, shape index: {}]   ;;  %s1077_s1 = inlined_call_operand.hbm [shape: bf16[1024,128], index: 1, kind: input, shape index: {}]   ;;  %s1078_s2 = inlined_call_operand.vmem [shape: f32[1,128], index: 2, kind: input, shape index: {}]   ;;  %s1079_s3 = inlined_call_operand.vmem [shape: f32[16,128], index: 3, kind: output, shape index: {}]  }
   0x1   :  { %s16_s13 = sshll.u32 %s1017_s12, 4  ;;  %s17_s13 = int_to_ptr.vmem [resolvable:$true] %s16_s13 }
   0x2   :  { %s1003_s14 = scalar_lea.vmem %s17_s13, 8192  ;;  %p1008_p1 = scmp.lt.s32.totalorder %s17_s13, %s17_s13 }
   0x3   :  { %p1004_p0 = scmp.ne.s32.totalorder %s17_s13, %s1003_s14  ;;  %p1009_p2 = scmp.lt.s32.totalorder %s1003_s14, %s1003_s14 }
   0x5   :  { %p1010_p3 = por %p1009_p2, %p1008_p1 }
   0x7   :  { %p1011_p4 = pnand %p1010_p3, %p1004_p0 }
   0x9   :  { %1014 = shalt.err (!%p1011_p4)
}
   0xa   :  { %s1018_s15 = smov 64   ;;  %s1019_s16 = smov 4  }
   0xb   :  { %22 = dma.hbm_to_vmem [thread:$0]  %s1077_s1, 8192, %s17_s13, [#allocation3], %s1018_s15, %s1018_s15, %s1019_s16  }
   0xc   :  { %1015 = dma.done.wait [#allocation3], 8192  }
   0xd   :  { %1016 = vsyncadd [#allocation3], 4294959104  ;;  %v931_v0 = vld [vmem:[#allocation2 + $0x78] sm:$0xff]   ;;  %v935_v4 = vld [vmem:[#allocation2 + $0x70] sm:$0xff]  }
   0xe   :  { %v932_v1 = vld [vmem:[#allocation2 + $0xf8] sm:$0xff]   ;;  %840 = vmatprep.subr.bf16.mxu0 %v931_v0  ;;  %v936_v5 = vld [vmem:[#allocation2 + $0xf0] sm:$0xff]   ;;  %v939_v8 = vld [vmem:[#allocation2 + $0x68] sm:$0xff]  }
   0xf   :  { %v933_v2 = vld [vmem:[#allocation2 + $0x38] sm:$0xff]   ;;  %862 = vmatprep.subr.bf16.mxu1 %v932_v1  ;;  %v937_v6 = vld [vmem:[#allocation2 + $0x30] sm:$0xff]   ;;  %v940_v9 = vld [vmem:[#allocation2 + $0xe8] sm:$0xff]  }
  0x10   :  { %v934_v3 = vld [vmem:[#allocation2 + $0xb8] sm:$0xff]   ;;  %841 = vmatpush3.bf16.msra.mxu0 %v933_v2  ;;  %v938_v7 = vld [vmem:[#allocation2 + $0xb0] sm:$0xff]   ;;  %v941_v10 = vld [vmem:[#allocation2 + $0x28] sm:$0xff]  }
  0x11   :  { %863 = vmatpush3.bf16.msra.mxu1 %v934_v3  ;;  %842 = vmatprep.subr.bf16.mxu0 %v935_v4  ;;  %v942_v11 = vld [vmem:[#allocation2 + $0xa8] sm:$0xff]   ;;  %v943_v12 = vld [vmem:[#allocation2 + $0x60] sm:$0xff]   ;;  %v947_v16 = vld [vmem:[#allocation2 + $0x58] sm:$0xff]  }
  0x12   :  { %864 = vmatprep.subr.bf16.mxu1 %v936_v5  ;;  %v944_v13 = vld [vmem:[#allocation2 + $0xe0] sm:$0xff]   ;;  %v948_v17 = vld [vmem:[#allocation2 + $0xd8] sm:$0xff]   ;;  %v951_v20 = vld [vmem:[#allocation2 + $0x50] sm:$0xff]  }
  0x13   :  { %v945_v14 = vld [vmem:[#allocation2 + $0x20] sm:$0xff]   ;;  %v949_v18 = vld [vmem:[#allocation2 + $0x18] sm:$0xff]   ;;  %v952_v21 = vld [vmem:[#allocation2 + $0xd0] sm:$0xff]  }
  0x14   :  { %843 = vmatpush3.bf16.msra.mxu0 %v937_v6  ;;  %v946_v15 = vld [vmem:[#allocation2 + $0xa0] sm:$0xff]   ;;  %v950_v19 = vld [vmem:[#allocation2 + $0x98] sm:$0xff]   ;;  %v953_v22 = vld [vmem:[#allocation2 + $0x10] sm:$0xff]  }
  0x15   :  { %865 = vmatpush3.bf16.msra.mxu1 %v938_v7  ;;  %844 = vmatprep.subr.bf16.mxu0 %v939_v8  ;;  %v954_v23 = vld [vmem:[#allocation2 + $0x90] sm:$0xff]   ;;  %v955_v24 = vld [vmem:[#allocation2 + $0x48] sm:$0xff]   ;;  %v959_v28 = vld [vmem:[#allocation2 + $0x40] sm:$0xff]  }
  0x16   :  { %866 = vmatprep.subr.bf16.mxu1 %v940_v9  ;;  %v956_v25 = vld [vmem:[#allocation2 + $0xc8] sm:$0xff]   ;;  %v960_v29 = vld [vmem:[#allocation2 + $0xc0] sm:$0xff]   ;;  %v963_v40 = vld [vmem:[#allocation2 + $0x178] sm:$0xff]  }
  0x17   :  { %v957_v26 = vld [vmem:[#allocation2 + $0x8] sm:$0xff]   ;;  %v961_v30 = vld [vmem:[#allocation2] sm:$0xff]   ;;  %v964_v41 = vld [vmem:[#allocation2 + $0x1f8] sm:$0xff]  }
  0x18   :  { %845 = vmatpush3.bf16.msra.mxu0 %v941_v10  ;;  %v958_v27 = vld [vmem:[#allocation2 + $0x88] sm:$0xff]   ;;  %v962_v31 = vld [vmem:[#allocation2 + $0x80] sm:$0xff]   ;;  %v965_v42 = vld [vmem:[#allocation2 + $0x138] sm:$0xff]  }
  0x19   :  { %867 = vmatpush3.bf16.msra.mxu1 %v942_v11  ;;  %846 = vmatprep.subr.bf16.mxu0 %v943_v12  ;;  %v29_v32 = vld [vmem:[%s1076_s0] sm:$0xff]  ;;  %v30_v34 = vld [vmem:[%s1076_s0 + $0x8] sm:$0xff]  ;;  %v966_v43 = vld [vmem:[#allocation2 + $0x1b8] sm:$0xff]  }
  0x1a   :  { %868 = vmatprep.subr.bf16.mxu1 %v944_v13  ;;  %v33_v33 = vld [vmem:[%s1076_s0 + $0x20] sm:$0xff]  ;;  %v34_v37 = vld [vmem:[%s1076_s0 + $0x28] sm:$0xff]  ;;  %v967_v44 = vld [vmem:[#allocation2 + $0x170] sm:$0xff]  }
  0x1b   :  { %v768_v35 = vcombine.low %v29_v32, %v33_v33  ;;  %v769_v36 = vcombine.high %v29_v32, %v33_v33  ;;  %v770_v38 = vcombine.low %v30_v34, %v34_v37  ;;  %v771_v39 = vcombine.high %v30_v34, %v34_v37  ;;  %v968_v45 = vld [vmem:[#allocation2 + $0x1f0] sm:$0xff]   ;;  %v971_v48 = vld [vmem:[#allocation2 + $0x168] sm:$0xff]   ;;  %v975_v52 = vld [vmem:[#allocation2 + $0x160] sm:$0xff]  }
  0x1c   :  { %847 = vmatpush3.bf16.msra.mxu0 %v945_v14  ;;  %v969_v46 = vld [vmem:[#allocation2 + $0x130] sm:$0xff]   ;;  %v972_v49 = vld [vmem:[#allocation2 + $0x1e8] sm:$0xff]   ;;  %v976_v53 = vld [vmem:[#allocation2 + $0x1e0] sm:$0xff]  }
  0x1d   :  { %869 = vmatpush3.bf16.msra.mxu1 %v946_v15  ;;  %848 = vmatprep.subr.bf16.mxu0 %v947_v16  ;;  %v970_v47 = vld [vmem:[#allocation2 + $0x1b0] sm:$0xff]   ;;  %v973_v50 = vld [vmem:[#allocation2 + $0x128] sm:$0xff]   ;;  %v977_v54 = vld [vmem:[#allocation2 + $0x120] sm:$0xff]  }
  0x1e   :  { %870 = vmatprep.subr.bf16.mxu1 %v948_v17  ;;  %628 = vmatprep.mubr.bf16.mxu0 %v769_v36  ;;  %v974_v51 = vld [vmem:[#allocation2 + $0x1a8] sm:$0xff]   ;;  %v978_v55 = vld [vmem:[#allocation2 + $0x1a0] sm:$0xff]   ;;  %v979_v56 = vld [vmem:[#allocation2 + $0x158] sm:$0xff]  }
  0x1f   :  { %669 = vmatprep.mubr.bf16.mxu1 %v771_v39  ;;  %v980_v57 = vld [vmem:[#allocation2 + $0x1d8] sm:$0xff]   ;;  %v983_v60 = vld [vmem:[#allocation2 + $0x150] sm:$0xff]   ;;  %v987_v0 = vld [vmem:[#allocation2 + $0x148] sm:$0xff]  }
  0x20   :  { %849 = vmatpush3.bf16.msra.mxu0 %v949_v18  ;;  %v981_v58 = vld [vmem:[#allocation2 + $0x118] sm:$0xff]   ;;  %v984_v61 = vld [vmem:[#allocation2 + $0x1d0] sm:$0xff]   ;;  %v988_v1 = vld [vmem:[#allocation2 + $0x1c8] sm:$0xff]  }
  0x21   :  { %871 = vmatpush3.bf16.msra.mxu1 %v950_v19  ;;  %850 = vmatprep.subr.bf16.mxu0 %v951_v20  ;;  %v982_v59 = vld [vmem:[#allocation2 + $0x198] sm:$0xff]   ;;  %v985_v62 = vld [vmem:[#allocation2 + $0x110] sm:$0xff]   ;;  %v989_v2 = vld [vmem:[#allocation2 + $0x108] sm:$0xff]  }
  0x22   :  { %872 = vmatprep.subr.bf16.mxu1 %v952_v21  ;;  %v986_v63 = vld [vmem:[#allocation2 + $0x190] sm:$0xff]   ;;  %v990_v3 = vld [vmem:[#allocation2 + $0x188] sm:$0xff]   ;;  %v991_v4 = vld [vmem:[#allocation2 + $0x140] sm:$0xff]  }
  0x23   :  { %v992_v5 = vld [vmem:[#allocation2 + $0x1c0] sm:$0xff]   ;;  %v31_v8 = vld [vmem:[%s1076_s0 + $0x10] sm:$0xff]  ;;  %v32_v12 = vld [vmem:[%s1076_s0 + $0x18] sm:$0xff] }
  0x24   :  { %851 = vmatpush3.bf16.msra.mxu0 %v953_v22  ;;  %v993_v6 = vld [vmem:[#allocation2 + $0x100] sm:$0xff]   ;;  %v35_v9 = vld [vmem:[%s1076_s0 + $0x30] sm:$0xff]  ;;  %v36_v13 = vld [vmem:[%s1076_s0 + $0x38] sm:$0xff] }
  0x25   :  { %873 = vmatpush3.bf16.msra.mxu1 %v954_v23  ;;  %852 = vmatprep.subr.bf16.mxu0 %v955_v24  ;;  %v994_v7 = vld [vmem:[#allocation2 + $0x180] sm:$0xff]   ;;  %v772_v10 = vcombine.low %v31_v8, %v35_v9  ;;  %v773_v11 = vcombine.high %v31_v8, %v35_v9  ;;  %v774_v14 = vcombine.low %v32_v12, %v36_v13 }
  0x26   :  { %874 = vmatprep.subr.bf16.mxu1 %v956_v25  ;;  %v775_v15 = vcombine.high %v32_v12, %v36_v13  ;;  %v767_v23 = vld [vmem:[%s1078_s2] ss:$0 sm:$0xff] }
  0x28   :  { %853 = vmatpush3.bf16.msra.mxu0 %v957_v26 }
  0x29   :  { %875 = vmatpush3.bf16.msra.mxu1 %v958_v27  ;;  %854 = vmatprep.subr.bf16.mxu0 %v959_v28 }
  0x2a   :  { %876 = vmatprep.subr.bf16.mxu1 %v960_v29 }
  0x2c   :  { %855 = vmatpush3.bf16.msra.mxu0 %v961_v30 }
  0x2d   :  { %877 = vmatpush3.bf16.msra.mxu1 %v962_v31  ;;  %884 = vmatprep.subr.bf16.mxu0 %v963_v40 }
  0x2e   :  { %906 = vmatprep.subr.bf16.mxu1 %v964_v41 }
  0x2f   :  { %629 = vmatmul.mubr.bf16.vlgmr.msra.gmra.mxu0 %v768_v35 }
  0x30   :  { %670 = vmatmul.mubr.bf16.vlgmr.msra.gmra.mxu1 %v770_v38  ;;  %885 = vmatpush3.bf16.msra.mxu0 %v965_v42 }
  0x31   :  { %907 = vmatpush3.bf16.msra.mxu1 %v966_v43  ;;  %886 = vmatprep.subr.bf16.mxu0 %v967_v44 }
  0x32   :  { %908 = vmatprep.subr.bf16.mxu1 %v968_v45  ;;  %710 = vmatprep.mubr.bf16.mxu0 %v773_v11 }
  0x33   :  { %751 = vmatprep.mubr.bf16.mxu1 %v775_v15 }
  0x34   :  { %887 = vmatpush3.bf16.msra.mxu0 %v969_v46 }
  0x35   :  { %909 = vmatpush3.bf16.msra.mxu1 %v970_v47  ;;  %888 = vmatprep.subr.bf16.mxu0 %v971_v48 }
  0x36   :  { %910 = vmatprep.subr.bf16.mxu1 %v972_v49 }
  0x38   :  { %889 = vmatpush3.bf16.msra.mxu0 %v973_v50 }
  0x39   :  { %911 = vmatpush3.bf16.msra.mxu1 %v974_v51  ;;  %890 = vmatprep.subr.bf16.mxu0 %v975_v52 }
  0x3a   :  { %912 = vmatprep.subr.bf16.mxu1 %v976_v53 }
  0x3c   :  { %891 = vmatpush3.bf16.msra.mxu0 %v977_v54 }
  0x3d   :  { %913 = vmatpush3.bf16.msra.mxu1 %v978_v55  ;;  %892 = vmatprep.subr.bf16.mxu0 %v979_v56 }
  0x3e   :  { %914 = vmatprep.subr.bf16.mxu1 %v980_v57 }
  0x40   :  { %893 = vmatpush3.bf16.msra.mxu0 %v981_v58 }
  0x41   :  { %915 = vmatpush3.bf16.msra.mxu1 %v982_v59  ;;  %894 = vmatprep.subr.bf16.mxu0 %v983_v60 }
  0x42   :  { %916 = vmatprep.subr.bf16.mxu1 %v984_v61 }
  0x44   :  { %895 = vmatpush3.bf16.msra.mxu0 %v985_v62 }
  0x45   :  { %917 = vmatpush3.bf16.msra.mxu1 %v986_v63  ;;  %896 = vmatprep.subr.bf16.mxu0 %v987_v0 }
  0x46   :  { %918 = vmatprep.subr.bf16.mxu1 %v988_v1 }
  0x48   :  { %897 = vmatpush3.bf16.msra.mxu0 %v989_v2 }
  0x49   :  { %919 = vmatpush3.bf16.msra.mxu1 %v990_v3  ;;  %898 = vmatprep.subr.bf16.mxu0 %v991_v4 }
  0x4a   :  { %920 = vmatprep.subr.bf16.mxu1 %v992_v5 }
  0x4c   :  { %899 = vmatpush3.bf16.msra.mxu0 %v993_v6 }
  0x4d   :  { %921 = vmatpush3.bf16.msra.mxu1 %v994_v7 }
  0x4f   :  { %711 = vmatmul.mubr.bf16.vlgmr.msra.gmra.mxu0 %v772_v10 }
  0x50   :  { %752 = vmatmul.mubr.bf16.vlgmr.msra.gmra.mxu1 %v774_v14 }
  0xef   :  { %v856_v16 = vpop.f32.mrf.mxu0 }
  0xf0   :  { %v878_v17 = vpop.f32.mrf.mxu1 }
  0xf1   :  { %v857_v18 = vpop.f32.mrf.mxu0 }
  0xf2   :  { %v879_v19 = vpop.f32.mrf.mxu1  ;;  %v858_v21 = vadd.f32 %v857_v18, %v856_v16 }
  0xf3   :  { %v859_v20 = vpop.f32.mrf.mxu0  ;;  %v880_v26 = vadd.f32 %v879_v19, %v878_v17 }
  0xf4   :  { %v881_v22 = vpop.f32.mrf.mxu1  ;;  %v631_v25 = vadd.f32 %v858_v21, %v767_v23 }
  0xf5   :  { %v860_v24 = vpop.f32.mrf.mxu0 }
  0xf6   :  { %v861_v27 = vadd.f32 %v860_v24, %v859_v20  ;;  %v882_v28 = vpop.f32.mrf.mxu1  ;;  %v672_v32 = vadd.f32 %v880_v26, %v631_v25 }
  0xf7   :  { %v883_v37 = vadd.f32 %v882_v28, %v881_v22 }
  0xf8   :  { %v634_v33 = vadd.f32 %v861_v27, %v767_v23 }
  0xfa   :  { %v675_v42 = vadd.f32 %v883_v37, %v634_v33 }
 0x10f   :  { %v900_v29 = vpop.f32.mrf.mxu0 }
 0x110   :  { %v922_v30 = vpop.f32.mrf.mxu1 }
 0x111   :  { %v901_v31 = vpop.f32.mrf.mxu0 }
 0x112   :  { %v902_v34 = vadd.f32 %v901_v31, %v900_v29  ;;  %v923_v35 = vpop.f32.mrf.mxu1 }
 0x113   :  { %v903_v36 = vpop.f32.mrf.mxu0  ;;  %v924_v39 = vadd.f32 %v923_v35, %v922_v30 }
 0x114   :  { %v713_v38 = vadd.f32 %v902_v34, %v672_v32  ;;  %v925_v40 = vpop.f32.mrf.mxu1 }
 0x115   :  { %v904_v41 = vpop.f32.mrf.mxu0 }
 0x116   :  { %v754_v43 = vadd.f32 %v924_v39, %v713_v38  ;;  %v905_v44 = vadd.f32 %v904_v41, %v903_v36  ;;  %v926_v45 = vpop.f32.mrf.mxu1 }
 0x117   :  { %v927_v47 = vadd.f32 %v926_v45, %v925_v40 }
 0x118   :  { %760 = vst [vmem:[%s1079_s3] sm:$0xff] %v754_v43  ;;  %v716_v46 = vadd.f32 %v905_v44, %v675_v42 }
 0x11a   :  { %v757_v48 = vadd.f32 %v927_v47, %v716_v46 }
 0x11c   :  { %761 = vst [vmem:[%s1079_s3 + $0x8] sm:$0xff] %v757_v48 }
 0x11d   :  { %766 = vsyncpa [#allocation3], 1 }

</bundles_post_ra>
